<compile_context>
chip_gen: v6e
topology: v6e:2x2x1
jax: 0.10.0
libtpu: 0.0.40
codegen_flags: <defaults>
</compile_context>

<pallas_src>
import functools

import jax
import jax.numpy as jnp
from jax.experimental import pallas as pl
from jax.experimental.pallas import tpu as pltpu


# ---------------------------------------------------------------------------
# Fused bidirectional-LSTM encoder kernel (no grid: everything fits in VMEM).
# Fused gate column layout (each block Hd wide):
#   [i_f, i_b, f_f, f_b, g_f, g_b, o_f, o_b]
# State layout: h, c are [B, 2*Hd] = [forward | backward].
# ---------------------------------------------------------------------------
def _bilstm_encoder_kernel(T, B, Hd, x_ref, wih_ref, whh_ref, b_ref,
                           h0_ref, c0_ref, out_ref, hn_ref, cn_ref):
    G = 8 * Hd
    H2 = 2 * Hd

    # Hoisted input projection for ALL time steps and BOTH directions:
    # one bf16 [T*B, E] x [E, 8*Hd] MXU pass, f32 accumulation.
    gx = (jnp.dot(x_ref[...], wih_ref[...],
                  preferred_element_type=jnp.float32) + b_ref[...])   # [T*B, G] f32

    # Hoisted fwd/bwd column combine (off the serial recurrence path):
    # forward gate blocks are the first Hd lanes of every 2*Hd pair.
    fwd_mask = (jax.lax.broadcasted_iota(jnp.int32, (B, G), 1) % H2) < Hd  # [B, G]
    gx_step = []
    for s in range(T):
        gxf = gx[s * B:(s + 1) * B, :]               # forward consumes time s
        gxb = gx[(T - 1 - s) * B:(T - s) * B, :]     # backward consumes T-1-s
        gx_step.append(jnp.where(fwd_mask, gxf, gxb))

    # Serial time recurrence, both directions per step; state kept in f32.
    h = h0_ref[...]                                  # [B, 2*Hd] f32
    c = c0_ref[...]                                  # [B, 2*Hd] f32
    out_f = [None] * T
    out_b = [None] * T
    for s in range(T):
        # one lane-dense block-diagonal hidden projection for both directions
        gh = jnp.dot(h.astype(jnp.bfloat16), whh_ref[...],
                     preferred_element_type=jnp.float32)          # [B, 8*Hd]
        gates = gh + gx_step[s]
        i_g = jax.nn.sigmoid(gates[:, 0 * H2:1 * H2])
        f_g = jax.nn.sigmoid(gates[:, 1 * H2:2 * H2])
        g_g = jnp.tanh(gates[:, 2 * H2:3 * H2])
        o_g = jax.nn.sigmoid(gates[:, 3 * H2:4 * H2])
        c = f_g * c + i_g * g_g
        h = o_g * jnp.tanh(c)
        out_f[s] = h[:, 0:Hd]            # forward output belongs at time s
        out_b[T - 1 - s] = h[:, Hd:H2]   # backward output belongs at time T-1-s

    # Single pair of full-slab stores instead of 2*T tiny masked stores.
    out_ref[:, :, 0:Hd] = jnp.stack(out_f, axis=0)   # [T, B, Hd]
    out_ref[:, :, Hd:H2] = jnp.stack(out_b, axis=0)  # [T, B, Hd]

    # final states, PyTorch layout [num_directions, B, Hd] (0 = fwd, 1 = bwd)
    hn_ref[0] = h[:, 0:Hd]
    hn_ref[1] = h[:, Hd:H2]
    cn_ref[0] = c[:, 0:Hd]
    cn_ref[1] = c[:, Hd:H2]


# ---------------------------------------------------------------------------
# One-time weight fusion (done at param-prep time, outside the hot path).
# ---------------------------------------------------------------------------
def _interleave_dirs(a_f, a_b, Hd):
    """[..., 4*Hd] fwd & bwd -> [..., 8*Hd] in blocks (i_f,i_b,f_f,f_b,...)."""
    lead = a_f.shape[:-1]
    a_f = a_f.reshape(lead + (4, Hd))
    a_b = a_b.reshape(lead + (4, Hd))
    return jnp.stack([a_f, a_b], axis=-2).reshape(lead + (8 * Hd,))


def fuse_encoder_params(raw):
    Hd = raw["w_hh_f"].shape[0]
    w_ih = _interleave_dirs(raw["w_ih_f"], raw["w_ih_b"], Hd)        # [E, 8Hd]
    zeros = jnp.zeros_like(raw["w_hh_f"])
    whh_f = _interleave_dirs(raw["w_hh_f"], zeros, Hd)               # [Hd, 8Hd]
    whh_b = _interleave_dirs(zeros, raw["w_hh_b"], Hd)               # [Hd, 8Hd]
    w_hh = jnp.concatenate([whh_f, whh_b], axis=0)                   # block-diag
    b = _interleave_dirs(raw["b_f"], raw["b_b"], Hd).reshape(1, 8 * Hd)
    # bf16 MXU operands (accumulation / bias / state stay f32 in-kernel).
    return {"w_ih": w_ih.astype(jnp.bfloat16),
            "w_hh": w_hh.astype(jnp.bfloat16),
            "b": b.astype(jnp.float32),
            "Hd": Hd}


# ---------------------------------------------------------------------------
# Encoder.forward
# ---------------------------------------------------------------------------
def encoder_forward(fused, x_tbe, hidden=None):
    """x_tbe: [T, B, E] -> (output [T,B,2Hd], (h_n [2,B,Hd], c_n [2,B,Hd]))."""
    T, B, E = x_tbe.shape
    Hd = fused["Hd"]
    if hidden is None:
        h0 = jnp.zeros((B, 2 * Hd), jnp.float32)
        c0 = jnp.zeros((B, 2 * Hd), jnp.float32)
    else:
        h0_raw, c0_raw = hidden                         # each [2, B, Hd]
        h0 = jnp.concatenate([h0_raw[0], h0_raw[1]], axis=-1).astype(jnp.float32)
        c0 = jnp.concatenate([c0_raw[0], c0_raw[1]], axis=-1).astype(jnp.float32)

    # bf16 MXU operand; contiguous flatten is metadata-only
    x_flat = x_tbe.astype(jnp.bfloat16).reshape(T * B, E)

    vmem = pl.BlockSpec(memory_space=pltpu.MemorySpace.VMEM)
    kernel = functools.partial(_bilstm_encoder_kernel, T, B, Hd)
    out, h_n, c_n = pl.pallas_call(
        kernel,
        in_specs=[vmem] * 6,
        out_specs=(vmem, vmem, vmem),
        out_shape=(
            jax.ShapeDtypeStruct((T, B, 2 * Hd), jnp.float32),
            jax.ShapeDtypeStruct((2, B, Hd), jnp.float32),
            jax.ShapeDtypeStruct((2, B, Hd), jnp.float32),
        ),
    )(x_flat, fused["w_ih"], fused["w_hh"], fused["b"], h0, c0)
    return out, (h_n, c_n)


# ---------------------------------------------------------------------------
# Pure-JAX f32 reference (for correctness check only).
# ---------------------------------------------------------------------------
def encoder_reference(raw, x_tbe, hidden=None):
    T, B, E = x_tbe.shape
    Hd = raw["w_hh_f"].shape[0]

    def step(x_t, h, c, w_ih, w_hh, b):
        gates = x_t @ w_ih + h @ w_hh + b
        i = jax.nn.sigmoid(gates[:, 0 * Hd:1 * Hd])
        f = jax.nn.sigmoid(gates[:, 1 * Hd:2 * Hd])
        g = jnp.tanh(gates[:, 2 * Hd:3 * Hd])
        o = jax.nn.sigmoid(gates[:, 3 * Hd:4 * Hd])
        c = f * c + i * g
        return o * jnp.tanh(c), c

    if hidden is None:
        h_f = c_f = h_b = c_b = jnp.zeros((B, Hd), jnp.float32)
    else:
        h0, c0 = hidden
        h_f, h_b, c_f, c_b = h0[0], h0[1], c0[0], c0[1]

    outs_f, outs_b = [], [None] * T
    for t in range(T):
        h_f, c_f = step(x_tbe[t], h_f, c_f, raw["w_ih_f"], raw["w_hh_f"], raw["b_f"])
        outs_f.append(h_f)
    for t in range(T - 1, -1, -1):
        h_b, c_b = step(x_tbe[t], h_b, c_b, raw["w_ih_b"], raw["w_hh_b"], raw["b_b"])
        outs_b[t] = h_b
    out = jnp.stack([jnp.concatenate([outs_f[t], outs_b[t]], -1) for t in range(T)], 0)
    return out, (jnp.stack([h_f, h_b], 0), jnp.stack([c_f, c_b], 0))


def init_raw_params(key, emb_dim=32, hidden_dim=16):
    Hd = hidden_dim
    ks = jax.random.split(key, 6)
    n = lambda k, shp: (0.1 * jax.random.normal(k, shp)).astype(jnp.float32)
    return {
        # gate order (i, f, g, o); weights stored [in, 4*Hd] (transposed torch)
        "w_ih_f": n(ks[0], (emb_dim, 4 * Hd)),
        "w_hh_f": n(ks[1], (Hd, 4 * Hd)),
        "b_f":    n(ks[2], (4 * Hd,)),   # = bias_ih_l0 + bias_hh_l0
        "w_ih_b": n(ks[3], (emb_dim, 4 * Hd)),
        "w_hh_b": n(ks[4], (Hd, 4 * Hd)),
        "b_b":    n(ks[5], (4 * Hd,)),   # = bias_ih_l0_rev + bias_hh_l0_rev
    }


if __name__ == "__main__":
    key = jax.random.PRNGKey(0)
    pkey, xkey = jax.random.split(key)

    T, B, E, Hd = 8, 2, 32, 16         # seq=8, batch=2, emb=32, hidden(per dir)=16
    raw = init_raw_params(pkey, emb_dim=E, hidden_dim=Hd)
    fused = fuse_encoder_params(raw)

    x = (0.5 * jax.random.normal(xkey, (T, B, E))).astype(jnp.float32)

    out, (h_n, c_n) = encoder_forward(fused, x, hidden=None)
    jax.block_until_ready((out, h_n, c_n))

    assert out.shape == (T, B, 2 * Hd)
    assert h_n.shape == (2, B, Hd) and c_n.shape == (2, B, Hd)
    assert bool(jnp.all(jnp.isfinite(out)))

    ref_out, (ref_hn, ref_cn) = encoder_reference(raw, x, hidden=None)
    # bf16 MXU operands -> compare to the f32 reference at bf16-level tolerance
    assert float(jnp.max(jnp.abs(out - ref_out))) < 2e-2
    assert float(jnp.max(jnp.abs(h_n - ref_hn))) < 2e-2
    assert float(jnp.max(jnp.abs(c_n - ref_cn))) < 2e-2

    print("KERNEL_OK")
</pallas_src>

<mosaic_0001>
module attributes {stable_mosaic.version = 11 : i64} {
  func.func @_bilstm_encoder_kernel(%arg0: memref<16x32xbf16, #tpu.memory_space<vmem>>, %arg1: memref<32x128xbf16, #tpu.memory_space<vmem>>, %arg2: memref<32x128xbf16, #tpu.memory_space<vmem>>, %arg3: memref<1x128xf32, #tpu.memory_space<vmem>>, %arg4: memref<2x32xf32, #tpu.memory_space<vmem>>, %arg5: memref<2x32xf32, #tpu.memory_space<vmem>>, %arg6: memref<8x2x32xf32, #tpu.memory_space<vmem>>, %arg7: memref<2x2x16xf32, #tpu.memory_space<vmem>>, %arg8: memref<2x2x16xf32, #tpu.memory_space<vmem>>) attributes {dimension_semantics = [], scalar_prefetch = 0 : i64, scratch_operands = 0 : i64, tpu.core_type = #tpu.core_type<tc>} {
    %c0 = arith.constant 0 : index
    %c0_0 = arith.constant 0 : index
    %0 = vector.load %arg0[%c0, %c0_0] : memref<16x32xbf16, #tpu.memory_space<vmem>>, vector<16x32xbf16>
    %c0_1 = arith.constant 0 : index
    %c0_2 = arith.constant 0 : index
    %1 = vector.load %arg1[%c0_1, %c0_2] : memref<32x128xbf16, #tpu.memory_space<vmem>>, vector<32x128xbf16>
    %cst = arith.constant dense<0.000000e+00> : vector<16x128xf32>
    %2 = tpu.matmul %0, %1, %cst {dimension_numbers = #tpu.dot_dimension_numbers<[1], [0], [0], [1], [0, 0, 1, 1], [], []>} : vector<16x32xbf16>, vector<32x128xbf16>, vector<16x128xf32> -> vector<16x128xf32>
    %c0_3 = arith.constant 0 : index
    %c0_4 = arith.constant 0 : index
    %3 = vector.load %arg3[%c0_3, %c0_4] : memref<1x128xf32, #tpu.memory_space<vmem>>, vector<1x128xf32>
    %4 = vector.broadcast %3 : vector<1x128xf32> to vector<16x128xf32>
    %5 = arith.addf %2, %4 : vector<16x128xf32>
    %6 = tpu.iota {dimensions = array<i32: 1>} : vector<2x128xi32>
    %c32_i32 = arith.constant 32 : i32
    %c0_i32 = arith.constant 0 : i32
    %7 = arith.cmpi eq, %c32_i32, %c0_i32 : i32
    %c1_i32 = arith.constant 1 : i32
    %8 = arith.select %7, %c1_i32, %c32_i32 : i32
    %9 = vector.broadcast %8 : i32 to vector<2x128xi32>
    %10 = arith.remsi %6, %9 : vector<2x128xi32>
    %c0_i32_5 = arith.constant 0 : i32
    %11 = vector.broadcast %c0_i32_5 : i32 to vector<2x128xi32>
    %12 = arith.cmpi ne, %10, %11 : vector<2x128xi32>
    %c0_i32_6 = arith.constant 0 : i32
    %13 = vector.broadcast %c0_i32_6 : i32 to vector<2x128xi32>
    %14 = arith.cmpi slt, %10, %13 : vector<2x128xi32>
    %c0_i32_7 = arith.constant 0 : i32
    %15 = arith.cmpi slt, %8, %c0_i32_7 : i32
    %16 = vector.broadcast %15 : i1 to vector<2x128xi1>
    %17 = vector.broadcast %16 : vector<2x128xi1> to vector<2x128xi1>
    %18 = arith.xori %14, %17 : vector<2x128xi1>
    %19 = arith.andi %18, %12 : vector<2x128xi1>
    %20 = vector.broadcast %8 : i32 to vector<2x128xi32>
    %21 = arith.addi %10, %20 : vector<2x128xi32>
    %22 = arith.select %19, %21, %10 : vector<2x128xi1>, vector<2x128xi32>
    %c16_i32 = arith.constant 16 : i32
    %23 = vector.broadcast %c16_i32 : i32 to vector<2x128xi32>
    %24 = arith.cmpi slt, %22, %23 : vector<2x128xi32>
    %25 = vector.extract_strided_slice %5 {offsets = [0, 0], sizes = [2, 128], strides = [1, 1]} : vector<16x128xf32> to vector<2x128xf32>
    %26 = vector.extract_strided_slice %5 {offsets = [14, 0], sizes = [2, 128], strides = [1, 1]} : vector<16x128xf32> to vector<2x128xf32>
    %27 = arith.select %24, %25, %26 : vector<2x128xi1>, vector<2x128xf32>
    %28 = vector.extract_strided_slice %5 {offsets = [2, 0], sizes = [2, 128], strides = [1, 1]} : vector<16x128xf32> to vector<2x128xf32>
    %29 = vector.extract_strided_slice %5 {offsets = [12, 0], sizes = [2, 128], strides = [1, 1]} : vector<16x128xf32> to vector<2x128xf32>
    %30 = arith.select %24, %28, %29 : vector<2x128xi1>, vector<2x128xf32>
    %31 = vector.extract_strided_slice %5 {offsets = [4, 0], sizes = [2, 128], strides = [1, 1]} : vector<16x128xf32> to vector<2x128xf32>
    %32 = vector.extract_strided_slice %5 {offsets = [10, 0], sizes = [2, 128], strides = [1, 1]} : vector<16x128xf32> to vector<2x128xf32>
    %33 = arith.select %24, %31, %32 : vector<2x128xi1>, vector<2x128xf32>
    %34 = vector.extract_strided_slice %5 {offsets = [6, 0], sizes = [2, 128], strides = [1, 1]} : vector<16x128xf32> to vector<2x128xf32>
    %35 = vector.extract_strided_slice %5 {offsets = [8, 0], sizes = [2, 128], strides = [1, 1]} : vector<16x128xf32> to vector<2x128xf32>
    %36 = arith.select %24, %34, %35 : vector<2x128xi1>, vector<2x128xf32>
    %37 = vector.extract_strided_slice %5 {offsets = [8, 0], sizes = [2, 128], strides = [1, 1]} : vector<16x128xf32> to vector<2x128xf32>
    %38 = vector.extract_strided_slice %5 {offsets = [6, 0], sizes = [2, 128], strides = [1, 1]} : vector<16x128xf32> to vector<2x128xf32>
    %39 = arith.select %24, %37, %38 : vector<2x128xi1>, vector<2x128xf32>
    %40 = vector.extract_strided_slice %5 {offsets = [10, 0], sizes = [2, 128], strides = [1, 1]} : vector<16x128xf32> to vector<2x128xf32>
    %41 = vector.extract_strided_slice %5 {offsets = [4, 0], sizes = [2, 128], strides = [1, 1]} : vector<16x128xf32> to vector<2x128xf32>
    %42 = arith.select %24, %40, %41 : vector<2x128xi1>, vector<2x128xf32>
    %43 = vector.extract_strided_slice %5 {offsets = [12, 0], sizes = [2, 128], strides = [1, 1]} : vector<16x128xf32> to vector<2x128xf32>
    %44 = vector.extract_strided_slice %5 {offsets = [2, 0], sizes = [2, 128], strides = [1, 1]} : vector<16x128xf32> to vector<2x128xf32>
    %45 = arith.select %24, %43, %44 : vector<2x128xi1>, vector<2x128xf32>
    %46 = vector.extract_strided_slice %5 {offsets = [14, 0], sizes = [2, 128], strides = [1, 1]} : vector<16x128xf32> to vector<2x128xf32>
    %47 = vector.extract_strided_slice %5 {offsets = [0, 0], sizes = [2, 128], strides = [1, 1]} : vector<16x128xf32> to vector<2x128xf32>
    %48 = arith.select %24, %46, %47 : vector<2x128xi1>, vector<2x128xf32>
    %c0_8 = arith.constant 0 : index
    %c0_9 = arith.constant 0 : index
    %49 = vector.load %arg4[%c0_8, %c0_9] : memref<2x32xf32, #tpu.memory_space<vmem>>, vector<2x32xf32>
    %c0_10 = arith.constant 0 : index
    %c0_11 = arith.constant 0 : index
    %50 = vector.load %arg5[%c0_10, %c0_11] : memref<2x32xf32, #tpu.memory_space<vmem>>, vector<2x32xf32>
    %51 = arith.truncf %49 : vector<2x32xf32> to vector<2x32xbf16>
    %c0_12 = arith.constant 0 : index
    %c0_13 = arith.constant 0 : index
    %52 = vector.load %arg2[%c0_12, %c0_13] : memref<32x128xbf16, #tpu.memory_space<vmem>>, vector<32x128xbf16>
    %cst_14 = arith.constant dense<0.000000e+00> : vector<2x128xf32>
    %53 = tpu.matmul %51, %52, %cst_14 {dimension_numbers = #tpu.dot_dimension_numbers<[1], [0], [0], [1], [0, 0, 1, 1], [], []>} : vector<2x32xbf16>, vector<32x128xbf16>, vector<2x128xf32> -> vector<2x128xf32>
    %54 = arith.addf %53, %27 : vector<2x128xf32>
    %55 = vector.extract_strided_slice %54 {offsets = [0, 0], sizes = [2, 32], strides = [1, 1]} : vector<2x128xf32> to vector<2x32xf32>
    %56 = arith.negf %55 : vector<2x32xf32>
    %57 = math.exp %56 : vector<2x32xf32>
    %cst_15 = arith.constant 1.000000e+00 : f32
    %58 = vector.broadcast %cst_15 : f32 to vector<2x32xf32>
    %59 = arith.addf %58, %57 : vector<2x32xf32>
    %60 = arith.divf %58, %59 : vector<2x32xf32>
    %61 = vector.extract_strided_slice %54 {offsets = [0, 32], sizes = [2, 32], strides = [1, 1]} : vector<2x128xf32> to vector<2x32xf32>
    %62 = arith.negf %61 : vector<2x32xf32>
    %63 = math.exp %62 : vector<2x32xf32>
    %cst_16 = arith.constant 1.000000e+00 : f32
    %64 = vector.broadcast %cst_16 : f32 to vector<2x32xf32>
    %65 = arith.addf %64, %63 : vector<2x32xf32>
    %66 = arith.divf %64, %65 : vector<2x32xf32>
    %67 = vector.extract_strided_slice %54 {offsets = [0, 64], sizes = [2, 32], strides = [1, 1]} : vector<2x128xf32> to vector<2x32xf32>
    %68 = math.tanh %67 : vector<2x32xf32>
    %69 = vector.extract_strided_slice %54 {offsets = [0, 96], sizes = [2, 32], strides = [1, 1]} : vector<2x128xf32> to vector<2x32xf32>
    %70 = arith.negf %69 : vector<2x32xf32>
    %71 = math.exp %70 : vector<2x32xf32>
    %cst_17 = arith.constant 1.000000e+00 : f32
    %72 = vector.broadcast %cst_17 : f32 to vector<2x32xf32>
    %73 = arith.addf %72, %71 : vector<2x32xf32>
    %74 = arith.divf %72, %73 : vector<2x32xf32>
    %75 = arith.mulf %66, %50 : vector<2x32xf32>
    %76 = arith.mulf %60, %68 : vector<2x32xf32>
    %77 = arith.addf %75, %76 : vector<2x32xf32>
    %78 = math.tanh %77 : vector<2x32xf32>
    %79 = arith.mulf %74, %78 : vector<2x32xf32>
    %80 = vector.extract_strided_slice %79 {offsets = [0, 0], sizes = [2, 16], strides = [1, 1]} : vector<2x32xf32> to vector<2x16xf32>
    %81 = vector.extract_strided_slice %79 {offsets = [0, 16], sizes = [2, 16], strides = [1, 1]} : vector<2x32xf32> to vector<2x16xf32>
    %82 = arith.truncf %79 : vector<2x32xf32> to vector<2x32xbf16>
    %c0_18 = arith.constant 0 : index
    %c0_19 = arith.constant 0 : index
    %83 = vector.load %arg2[%c0_18, %c0_19] : memref<32x128xbf16, #tpu.memory_space<vmem>>, vector<32x128xbf16>
    %cst_20 = arith.constant dense<0.000000e+00> : vector<2x128xf32>
    %84 = tpu.matmul %82, %83, %cst_20 {dimension_numbers = #tpu.dot_dimension_numbers<[1], [0], [0], [1], [0, 0, 1, 1], [], []>} : vector<2x32xbf16>, vector<32x128xbf16>, vector<2x128xf32> -> vector<2x128xf32>
    %85 = arith.addf %84, %30 : vector<2x128xf32>
    %86 = vector.extract_strided_slice %85 {offsets = [0, 0], sizes = [2, 32], strides = [1, 1]} : vector<2x128xf32> to vector<2x32xf32>
    %87 = arith.negf %86 : vector<2x32xf32>
    %88 = math.exp %87 : vector<2x32xf32>
    %cst_21 = arith.constant 1.000000e+00 : f32
    %89 = vector.broadcast %cst_21 : f32 to vector<2x32xf32>
    %90 = arith.addf %89, %88 : vector<2x32xf32>
    %91 = arith.divf %89, %90 : vector<2x32xf32>
    %92 = vector.extract_strided_slice %85 {offsets = [0, 32], sizes = [2, 32], strides = [1, 1]} : vector<2x128xf32> to vector<2x32xf32>
    %93 = arith.negf %92 : vector<2x32xf32>
    %94 = math.exp %93 : vector<2x32xf32>
    %cst_22 = arith.constant 1.000000e+00 : f32
    %95 = vector.broadcast %cst_22 : f32 to vector<2x32xf32>
    %96 = arith.addf %95, %94 : vector<2x32xf32>
    %97 = arith.divf %95, %96 : vector<2x32xf32>
    %98 = vector.extract_strided_slice %85 {offsets = [0, 64], sizes = [2, 32], strides = [1, 1]} : vector<2x128xf32> to vector<2x32xf32>
    %99 = math.tanh %98 : vector<2x32xf32>
    %100 = vector.extract_strided_slice %85 {offsets = [0, 96], sizes = [2, 32], strides = [1, 1]} : vector<2x128xf32> to vector<2x32xf32>
    %101 = arith.negf %100 : vector<2x32xf32>
    %102 = math.exp %101 : vector<2x32xf32>
    %cst_23 = arith.constant 1.000000e+00 : f32
    %103 = vector.broadcast %cst_23 : f32 to vector<2x32xf32>
    %104 = arith.addf %103, %102 : vector<2x32xf32>
    %105 = arith.divf %103, %104 : vector<2x32xf32>
    %106 = arith.mulf %97, %77 : vector<2x32xf32>
    %107 = arith.mulf %91, %99 : vector<2x32xf32>
    %108 = arith.addf %106, %107 : vector<2x32xf32>
    %109 = math.tanh %108 : vector<2x32xf32>
    %110 = arith.mulf %105, %109 : vector<2x32xf32>
    %111 = vector.extract_strided_slice %110 {offsets = [0, 0], sizes = [2, 16], strides = [1, 1]} : vector<2x32xf32> to vector<2x16xf32>
    %112 = vector.extract_strided_slice %110 {offsets = [0, 16], sizes = [2, 16], strides = [1, 1]} : vector<2x32xf32> to vector<2x16xf32>
    %113 = arith.truncf %110 : vector<2x32xf32> to vector<2x32xbf16>
    %c0_24 = arith.constant 0 : index
    %c0_25 = arith.constant 0 : index
    %114 = vector.load %arg2[%c0_24, %c0_25] : memref<32x128xbf16, #tpu.memory_space<vmem>>, vector<32x128xbf16>
    %cst_26 = arith.constant dense<0.000000e+00> : vector<2x128xf32>
    %115 = tpu.matmul %113, %114, %cst_26 {dimension_numbers = #tpu.dot_dimension_numbers<[1], [0], [0], [1], [0, 0, 1, 1], [], []>} : vector<2x32xbf16>, vector<32x128xbf16>, vector<2x128xf32> -> vector<2x128xf32>
    %116 = arith.addf %115, %33 : vector<2x128xf32>
    %117 = vector.extract_strided_slice %116 {offsets = [0, 0], sizes = [2, 32], strides = [1, 1]} : vector<2x128xf32> to vector<2x32xf32>
    %118 = arith.negf %117 : vector<2x32xf32>
    %119 = math.exp %118 : vector<2x32xf32>
    %cst_27 = arith.constant 1.000000e+00 : f32
    %120 = vector.broadcast %cst_27 : f32 to vector<2x32xf32>
    %121 = arith.addf %120, %119 : vector<2x32xf32>
    %122 = arith.divf %120, %121 : vector<2x32xf32>
    %123 = vector.extract_strided_slice %116 {offsets = [0, 32], sizes = [2, 32], strides = [1, 1]} : vector<2x128xf32> to vector<2x32xf32>
    %124 = arith.negf %123 : vector<2x32xf32>
    %125 = math.exp %124 : vector<2x32xf32>
    %cst_28 = arith.constant 1.000000e+00 : f32
    %126 = vector.broadcast %cst_28 : f32 to vector<2x32xf32>
    %127 = arith.addf %126, %125 : vector<2x32xf32>
    %128 = arith.divf %126, %127 : vector<2x32xf32>
    %129 = vector.extract_strided_slice %116 {offsets = [0, 64], sizes = [2, 32], strides = [1, 1]} : vector<2x128xf32> to vector<2x32xf32>
    %130 = math.tanh %129 : vector<2x32xf32>
    %131 = vector.extract_strided_slice %116 {offsets = [0, 96], sizes = [2, 32], strides = [1, 1]} : vector<2x128xf32> to vector<2x32xf32>
    %132 = arith.negf %131 : vector<2x32xf32>
    %133 = math.exp %132 : vector<2x32xf32>
    %cst_29 = arith.constant 1.000000e+00 : f32
    %134 = vector.broadcast %cst_29 : f32 to vector<2x32xf32>
    %135 = arith.addf %134, %133 : vector<2x32xf32>
    %136 = arith.divf %134, %135 : vector<2x32xf32>
    %137 = arith.mulf %128, %108 : vector<2x32xf32>
    %138 = arith.mulf %122, %130 : vector<2x32xf32>
    %139 = arith.addf %137, %138 : vector<2x32xf32>
    %140 = math.tanh %139 : vector<2x32xf32>
    %141 = arith.mulf %136, %140 : vector<2x32xf32>
    %142 = vector.extract_strided_slice %141 {offsets = [0, 0], sizes = [2, 16], strides = [1, 1]} : vector<2x32xf32> to vector<2x16xf32>
    %143 = vector.extract_strided_slice %141 {offsets = [0, 16], sizes = [2, 16], strides = [1, 1]} : vector<2x32xf32> to vector<2x16xf32>
    %144 = arith.truncf %141 : vector<2x32xf32> to vector<2x32xbf16>
    %c0_30 = arith.constant 0 : index
    %c0_31 = arith.constant 0 : index
    %145 = vector.load %arg2[%c0_30, %c0_31] : memref<32x128xbf16, #tpu.memory_space<vmem>>, vector<32x128xbf16>
    %cst_32 = arith.constant dense<0.000000e+00> : vector<2x128xf32>
    %146 = tpu.matmul %144, %145, %cst_32 {dimension_numbers = #tpu.dot_dimension_numbers<[1], [0], [0], [1], [0, 0, 1, 1], [], []>} : vector<2x32xbf16>, vector<32x128xbf16>, vector<2x128xf32> -> vector<2x128xf32>
    %147 = arith.addf %146, %36 : vector<2x128xf32>
    %148 = vector.extract_strided_slice %147 {offsets = [0, 0], sizes = [2, 32], strides = [1, 1]} : vector<2x128xf32> to vector<2x32xf32>
    %149 = arith.negf %148 : vector<2x32xf32>
    %150 = math.exp %149 : vector<2x32xf32>
    %cst_33 = arith.constant 1.000000e+00 : f32
    %151 = vector.broadcast %cst_33 : f32 to vector<2x32xf32>
    %152 = arith.addf %151, %150 : vector<2x32xf32>
    %153 = arith.divf %151, %152 : vector<2x32xf32>
    %154 = vector.extract_strided_slice %147 {offsets = [0, 32], sizes = [2, 32], strides = [1, 1]} : vector<2x128xf32> to vector<2x32xf32>
    %155 = arith.negf %154 : vector<2x32xf32>
    %156 = math.exp %155 : vector<2x32xf32>
    %cst_34 = arith.constant 1.000000e+00 : f32
    %157 = vector.broadcast %cst_34 : f32 to vector<2x32xf32>
    %158 = arith.addf %157, %156 : vector<2x32xf32>
    %159 = arith.divf %157, %158 : vector<2x32xf32>
    %160 = vector.extract_strided_slice %147 {offsets = [0, 64], sizes = [2, 32], strides = [1, 1]} : vector<2x128xf32> to vector<2x32xf32>
    %161 = math.tanh %160 : vector<2x32xf32>
    %162 = vector.extract_strided_slice %147 {offsets = [0, 96], sizes = [2, 32], strides = [1, 1]} : vector<2x128xf32> to vector<2x32xf32>
    %163 = arith.negf %162 : vector<2x32xf32>
    %164 = math.exp %163 : vector<2x32xf32>
    %cst_35 = arith.constant 1.000000e+00 : f32
    %165 = vector.broadcast %cst_35 : f32 to vector<2x32xf32>
    %166 = arith.addf %165, %164 : vector<2x32xf32>
    %167 = arith.divf %165, %166 : vector<2x32xf32>
    %168 = arith.mulf %159, %139 : vector<2x32xf32>
    %169 = arith.mulf %153, %161 : vector<2x32xf32>
    %170 = arith.addf %168, %169 : vector<2x32xf32>
    %171 = math.tanh %170 : vector<2x32xf32>
    %172 = arith.mulf %167, %171 : vector<2x32xf32>
    %173 = vector.extract_strided_slice %172 {offsets = [0, 0], sizes = [2, 16], strides = [1, 1]} : vector<2x32xf32> to vector<2x16xf32>
    %174 = vector.extract_strided_slice %172 {offsets = [0, 16], sizes = [2, 16], strides = [1, 1]} : vector<2x32xf32> to vector<2x16xf32>
    %175 = arith.truncf %172 : vector<2x32xf32> to vector<2x32xbf16>
    %c0_36 = arith.constant 0 : index
    %c0_37 = arith.constant 0 : index
    %176 = vector.load %arg2[%c0_36, %c0_37] : memref<32x128xbf16, #tpu.memory_space<vmem>>, vector<32x128xbf16>
    %cst_38 = arith.constant dense<0.000000e+00> : vector<2x128xf32>
    %177 = tpu.matmul %175, %176, %cst_38 {dimension_numbers = #tpu.dot_dimension_numbers<[1], [0], [0], [1], [0, 0, 1, 1], [], []>} : vector<2x32xbf16>, vector<32x128xbf16>, vector<2x128xf32> -> vector<2x128xf32>
    %178 = arith.addf %177, %39 : vector<2x128xf32>
    %179 = vector.extract_strided_slice %178 {offsets = [0, 0], sizes = [2, 32], strides = [1, 1]} : vector<2x128xf32> to vector<2x32xf32>
    %180 = arith.negf %179 : vector<2x32xf32>
    %181 = math.exp %180 : vector<2x32xf32>
    %cst_39 = arith.constant 1.000000e+00 : f32
    %182 = vector.broadcast %cst_39 : f32 to vector<2x32xf32>
    %183 = arith.addf %182, %181 : vector<2x32xf32>
    %184 = arith.divf %182, %183 : vector<2x32xf32>
    %185 = vector.extract_strided_slice %178 {offsets = [0, 32], sizes = [2, 32], strides = [1, 1]} : vector<2x128xf32> to vector<2x32xf32>
    %186 = arith.negf %185 : vector<2x32xf32>
    %187 = math.exp %186 : vector<2x32xf32>
    %cst_40 = arith.constant 1.000000e+00 : f32
    %188 = vector.broadcast %cst_40 : f32 to vector<2x32xf32>
    %189 = arith.addf %188, %187 : vector<2x32xf32>
    %190 = arith.divf %188, %189 : vector<2x32xf32>
    %191 = vector.extract_strided_slice %178 {offsets = [0, 64], sizes = [2, 32], strides = [1, 1]} : vector<2x128xf32> to vector<2x32xf32>
    %192 = math.tanh %191 : vector<2x32xf32>
    %193 = vector.extract_strided_slice %178 {offsets = [0, 96], sizes = [2, 32], strides = [1, 1]} : vector<2x128xf32> to vector<2x32xf32>
    %194 = arith.negf %193 : vector<2x32xf32>
    %195 = math.exp %194 : vector<2x32xf32>
    %cst_41 = arith.constant 1.000000e+00 : f32
    %196 = vector.broadcast %cst_41 : f32 to vector<2x32xf32>
    %197 = arith.addf %196, %195 : vector<2x32xf32>
    %198 = arith.divf %196, %197 : vector<2x32xf32>
    %199 = arith.mulf %190, %170 : vector<2x32xf32>
    %200 = arith.mulf %184, %192 : vector<2x32xf32>
    %201 = arith.addf %199, %200 : vector<2x32xf32>
    %202 = math.tanh %201 : vector<2x32xf32>
    %203 = arith.mulf %198, %202 : vector<2x32xf32>
    %204 = vector.extract_strided_slice %203 {offsets = [0, 0], sizes = [2, 16], strides = [1, 1]} : vector<2x32xf32> to vector<2x16xf32>
    %205 = vector.extract_strided_slice %203 {offsets = [0, 16], sizes = [2, 16], strides = [1, 1]} : vector<2x32xf32> to vector<2x16xf32>
    %206 = arith.truncf %203 : vector<2x32xf32> to vector<2x32xbf16>
    %c0_42 = arith.constant 0 : index
    %c0_43 = arith.constant 0 : index
    %207 = vector.load %arg2[%c0_42, %c0_43] : memref<32x128xbf16, #tpu.memory_space<vmem>>, vector<32x128xbf16>
    %cst_44 = arith.constant dense<0.000000e+00> : vector<2x128xf32>
    %208 = tpu.matmul %206, %207, %cst_44 {dimension_numbers = #tpu.dot_dimension_numbers<[1], [0], [0], [1], [0, 0, 1, 1], [], []>} : vector<2x32xbf16>, vector<32x128xbf16>, vector<2x128xf32> -> vector<2x128xf32>
    %209 = arith.addf %208, %42 : vector<2x128xf32>
    %210 = vector.extract_strided_slice %209 {offsets = [0, 0], sizes = [2, 32], strides = [1, 1]} : vector<2x128xf32> to vector<2x32xf32>
    %211 = arith.negf %210 : vector<2x32xf32>
    %212 = math.exp %211 : vector<2x32xf32>
    %cst_45 = arith.constant 1.000000e+00 : f32
    %213 = vector.broadcast %cst_45 : f32 to vector<2x32xf32>
    %214 = arith.addf %213, %212 : vector<2x32xf32>
    %215 = arith.divf %213, %214 : vector<2x32xf32>
    %216 = vector.extract_strided_slice %209 {offsets = [0, 32], sizes = [2, 32], strides = [1, 1]} : vector<2x128xf32> to vector<2x32xf32>
    %217 = arith.negf %216 : vector<2x32xf32>
    %218 = math.exp %217 : vector<2x32xf32>
    %cst_46 = arith.constant 1.000000e+00 : f32
    %219 = vector.broadcast %cst_46 : f32 to vector<2x32xf32>
    %220 = arith.addf %219, %218 : vector<2x32xf32>
    %221 = arith.divf %219, %220 : vector<2x32xf32>
    %222 = vector.extract_strided_slice %209 {offsets = [0, 64], sizes = [2, 32], strides = [1, 1]} : vector<2x128xf32> to vector<2x32xf32>
    %223 = math.tanh %222 : vector<2x32xf32>
    %224 = vector.extract_strided_slice %209 {offsets = [0, 96], sizes = [2, 32], strides = [1, 1]} : vector<2x128xf32> to vector<2x32xf32>
    %225 = arith.negf %224 : vector<2x32xf32>
    %226 = math.exp %225 : vector<2x32xf32>
    %cst_47 = arith.constant 1.000000e+00 : f32
    %227 = vector.broadcast %cst_47 : f32 to vector<2x32xf32>
    %228 = arith.addf %227, %226 : vector<2x32xf32>
    %229 = arith.divf %227, %228 : vector<2x32xf32>
    %230 = arith.mulf %221, %201 : vector<2x32xf32>
    %231 = arith.mulf %215, %223 : vector<2x32xf32>
    %232 = arith.addf %230, %231 : vector<2x32xf32>
    %233 = math.tanh %232 : vector<2x32xf32>
    %234 = arith.mulf %229, %233 : vector<2x32xf32>
    %235 = vector.extract_strided_slice %234 {offsets = [0, 0], sizes = [2, 16], strides = [1, 1]} : vector<2x32xf32> to vector<2x16xf32>
    %236 = vector.extract_strided_slice %234 {offsets = [0, 16], sizes = [2, 16], strides = [1, 1]} : vector<2x32xf32> to vector<2x16xf32>
    %237 = arith.truncf %234 : vector<2x32xf32> to vector<2x32xbf16>
    %c0_48 = arith.constant 0 : index
    %c0_49 = arith.constant 0 : index
    %238 = vector.load %arg2[%c0_48, %c0_49] : memref<32x128xbf16, #tpu.memory_space<vmem>>, vector<32x128xbf16>
    %cst_50 = arith.constant dense<0.000000e+00> : vector<2x128xf32>
    %239 = tpu.matmul %237, %238, %cst_50 {dimension_numbers = #tpu.dot_dimension_numbers<[1], [0], [0], [1], [0, 0, 1, 1], [], []>} : vector<2x32xbf16>, vector<32x128xbf16>, vector<2x128xf32> -> vector<2x128xf32>
    %240 = arith.addf %239, %45 : vector<2x128xf32>
    %241 = vector.extract_strided_slice %240 {offsets = [0, 0], sizes = [2, 32], strides = [1, 1]} : vector<2x128xf32> to vector<2x32xf32>
    %242 = arith.negf %241 : vector<2x32xf32>
    %243 = math.exp %242 : vector<2x32xf32>
    %cst_51 = arith.constant 1.000000e+00 : f32
    %244 = vector.broadcast %cst_51 : f32 to vector<2x32xf32>
    %245 = arith.addf %244, %243 : vector<2x32xf32>
    %246 = arith.divf %244, %245 : vector<2x32xf32>
    %247 = vector.extract_strided_slice %240 {offsets = [0, 32], sizes = [2, 32], strides = [1, 1]} : vector<2x128xf32> to vector<2x32xf32>
    %248 = arith.negf %247 : vector<2x32xf32>
    %249 = math.exp %248 : vector<2x32xf32>
    %cst_52 = arith.constant 1.000000e+00 : f32
    %250 = vector.broadcast %cst_52 : f32 to vector<2x32xf32>
    %251 = arith.addf %250, %249 : vector<2x32xf32>
    %252 = arith.divf %250, %251 : vector<2x32xf32>
    %253 = vector.extract_strided_slice %240 {offsets = [0, 64], sizes = [2, 32], strides = [1, 1]} : vector<2x128xf32> to vector<2x32xf32>
    %254 = math.tanh %253 : vector<2x32xf32>
    %255 = vector.extract_strided_slice %240 {offsets = [0, 96], sizes = [2, 32], strides = [1, 1]} : vector<2x128xf32> to vector<2x32xf32>
    %256 = arith.negf %255 : vector<2x32xf32>
    %257 = math.exp %256 : vector<2x32xf32>
    %cst_53 = arith.constant 1.000000e+00 : f32
    %258 = vector.broadcast %cst_53 : f32 to vector<2x32xf32>
    %259 = arith.addf %258, %257 : vector<2x32xf32>
    %260 = arith.divf %258, %259 : vector<2x32xf32>
    %261 = arith.mulf %252, %232 : vector<2x32xf32>
    %262 = arith.mulf %246, %254 : vector<2x32xf32>
    %263 = arith.addf %261, %262 : vector<2x32xf32>
    %264 = math.tanh %263 : vector<2x32xf32>
    %265 = arith.mulf %260, %264 : vector<2x32xf32>
    %266 = vector.extract_strided_slice %265 {offsets = [0, 0], sizes = [2, 16], strides = [1, 1]} : vector<2x32xf32> to vector<2x16xf32>
    %267 = vector.extract_strided_slice %265 {offsets = [0, 16], sizes = [2, 16], strides = [1, 1]} : vector<2x32xf32> to vector<2x16xf32>
    %268 = arith.truncf %265 : vector<2x32xf32> to vector<2x32xbf16>
    %c0_54 = arith.constant 0 : index
    %c0_55 = arith.constant 0 : index
    %269 = vector.load %arg2[%c0_54, %c0_55] : memref<32x128xbf16, #tpu.memory_space<vmem>>, vector<32x128xbf16>
    %cst_56 = arith.constant dense<0.000000e+00> : vector<2x128xf32>
    %270 = tpu.matmul %268, %269, %cst_56 {dimension_numbers = #tpu.dot_dimension_numbers<[1], [0], [0], [1], [0, 0, 1, 1], [], []>} : vector<2x32xbf16>, vector<32x128xbf16>, vector<2x128xf32> -> vector<2x128xf32>
    %271 = arith.addf %270, %48 : vector<2x128xf32>
    %272 = vector.extract_strided_slice %271 {offsets = [0, 0], sizes = [2, 32], strides = [1, 1]} : vector<2x128xf32> to vector<2x32xf32>
    %273 = arith.negf %272 : vector<2x32xf32>
    %274 = math.exp %273 : vector<2x32xf32>
    %cst_57 = arith.constant 1.000000e+00 : f32
    %275 = vector.broadcast %cst_57 : f32 to vector<2x32xf32>
    %276 = arith.addf %275, %274 : vector<2x32xf32>
    %277 = arith.divf %275, %276 : vector<2x32xf32>
    %278 = vector.extract_strided_slice %271 {offsets = [0, 32], sizes = [2, 32], strides = [1, 1]} : vector<2x128xf32> to vector<2x32xf32>
    %279 = arith.negf %278 : vector<2x32xf32>
    %280 = math.exp %279 : vector<2x32xf32>
    %cst_58 = arith.constant 1.000000e+00 : f32
    %281 = vector.broadcast %cst_58 : f32 to vector<2x32xf32>
    %282 = arith.addf %281, %280 : vector<2x32xf32>
    %283 = arith.divf %281, %282 : vector<2x32xf32>
    %284 = vector.extract_strided_slice %271 {offsets = [0, 64], sizes = [2, 32], strides = [1, 1]} : vector<2x128xf32> to vector<2x32xf32>
    %285 = math.tanh %284 : vector<2x32xf32>
    %286 = vector.extract_strided_slice %271 {offsets = [0, 96], sizes = [2, 32], strides = [1, 1]} : vector<2x128xf32> to vector<2x32xf32>
    %287 = arith.negf %286 : vector<2x32xf32>
    %288 = math.exp %287 : vector<2x32xf32>
    %cst_59 = arith.constant 1.000000e+00 : f32
    %289 = vector.broadcast %cst_59 : f32 to vector<2x32xf32>
    %290 = arith.addf %289, %288 : vector<2x32xf32>
    %291 = arith.divf %289, %290 : vector<2x32xf32>
    %292 = arith.mulf %283, %263 : vector<2x32xf32>
    %293 = arith.mulf %277, %285 : vector<2x32xf32>
    %294 = arith.addf %292, %293 : vector<2x32xf32>
    %295 = math.tanh %294 : vector<2x32xf32>
    %296 = arith.mulf %291, %295 : vector<2x32xf32>
    %297 = vector.extract_strided_slice %296 {offsets = [0, 0], sizes = [2, 16], strides = [1, 1]} : vector<2x32xf32> to vector<2x16xf32>
    %298 = vector.extract_strided_slice %296 {offsets = [0, 16], sizes = [2, 16], strides = [1, 1]} : vector<2x32xf32> to vector<2x16xf32>
    %299 = vector.shape_cast %80 : vector<2x16xf32> to vector<1x2x16xf32>
    %300 = vector.shape_cast %111 : vector<2x16xf32> to vector<1x2x16xf32>
    %301 = vector.shape_cast %142 : vector<2x16xf32> to vector<1x2x16xf32>
    %302 = vector.shape_cast %173 : vector<2x16xf32> to vector<1x2x16xf32>
    %303 = vector.shape_cast %204 : vector<2x16xf32> to vector<1x2x16xf32>
    %304 = vector.shape_cast %235 : vector<2x16xf32> to vector<1x2x16xf32>
    %305 = vector.shape_cast %266 : vector<2x16xf32> to vector<1x2x16xf32>
    %306 = vector.shape_cast %297 : vector<2x16xf32> to vector<1x2x16xf32>
    %307 = tpu.concatenate %299, %300, %301, %302, %303, %304, %305, %306 in 0 : vector<1x2x16xf32>, vector<1x2x16xf32>, vector<1x2x16xf32>, vector<1x2x16xf32>, vector<1x2x16xf32>, vector<1x2x16xf32>, vector<1x2x16xf32>, vector<1x2x16xf32> -> vector<8x2x16xf32>
    %c0_60 = arith.constant 0 : index
    %c0_61 = arith.constant 0 : index
    %c0_62 = arith.constant 0 : index
    %308 = vector.load %arg6[%c0_60, %c0_61, %c0_62] : memref<8x2x32xf32, #tpu.memory_space<vmem>>, vector<8x2x16xf32>
    tpu.vector_store %arg6[%c0_60, %c0_61, %c0_62], %307 {strides = array<i32>} : memref<8x2x32xf32, #tpu.memory_space<vmem>>, vector<8x2x16xf32>,
    %309 = vector.shape_cast %298 : vector<2x16xf32> to vector<1x2x16xf32>
    %310 = vector.shape_cast %267 : vector<2x16xf32> to vector<1x2x16xf32>
    %311 = vector.shape_cast %236 : vector<2x16xf32> to vector<1x2x16xf32>
    %312 = vector.shape_cast %205 : vector<2x16xf32> to vector<1x2x16xf32>
    %313 = vector.shape_cast %174 : vector<2x16xf32> to vector<1x2x16xf32>
    %314 = vector.shape_cast %143 : vector<2x16xf32> to vector<1x2x16xf32>
    %315 = vector.shape_cast %112 : vector<2x16xf32> to vector<1x2x16xf32>
    %316 = vector.shape_cast %81 : vector<2x16xf32> to vector<1x2x16xf32>
    %317 = tpu.concatenate %309, %310, %311, %312, %313, %314, %315, %316 in 0 : vector<1x2x16xf32>, vector<1x2x16xf32>, vector<1x2x16xf32>, vector<1x2x16xf32>, vector<1x2x16xf32>, vector<1x2x16xf32>, vector<1x2x16xf32>, vector<1x2x16xf32> -> vector<8x2x16xf32>
    %c0_63 = arith.constant 0 : index
    %c0_64 = arith.constant 0 : index
    %c16 = arith.constant 16 : index
    %318 = vector.load %arg6[%c0_63, %c0_64, %c16] : memref<8x2x32xf32, #tpu.memory_space<vmem>>, vector<8x2x16xf32>
    tpu.vector_store %arg6[%c0_63, %c0_64, %c16], %317 {strides = array<i32>} : memref<8x2x32xf32, #tpu.memory_space<vmem>>, vector<8x2x16xf32>,
    %319 = vector.extract_strided_slice %296 {offsets = [0, 0], sizes = [2, 16], strides = [1, 1]} : vector<2x32xf32> to vector<2x16xf32>
    %c0_65 = arith.constant 0 : index
    %c0_66 = arith.constant 0 : index
    %c0_67 = arith.constant 0 : index
    %320 = vector.load %arg7[%c0_65, %c0_66, %c0_67] : memref<2x2x16xf32, #tpu.memory_space<vmem>>, vector<1x2x16xf32>
    %321 = vector.shape_cast %320 : vector<1x2x16xf32> to vector<2x16xf32>
    %322 = vector.shape_cast %319 : vector<2x16xf32> to vector<1x2x16xf32>
    tpu.vector_store %arg7[%c0_65, %c0_66, %c0_67], %322 {strides = array<i32>} : memref<2x2x16xf32, #tpu.memory_space<vmem>>, vector<1x2x16xf32>,
    %323 = vector.extract_strided_slice %296 {offsets = [0, 16], sizes = [2, 16], strides = [1, 1]} : vector<2x32xf32> to vector<2x16xf32>
    %c1 = arith.constant 1 : index
    %c0_68 = arith.constant 0 : index
    %c0_69 = arith.constant 0 : index
    %324 = vector.load %arg7[%c1, %c0_68, %c0_69] : memref<2x2x16xf32, #tpu.memory_space<vmem>>, vector<1x2x16xf32>
    %325 = vector.shape_cast %324 : vector<1x2x16xf32> to vector<2x16xf32>
    %326 = vector.shape_cast %323 : vector<2x16xf32> to vector<1x2x16xf32>
    tpu.vector_store %arg7[%c1, %c0_68, %c0_69], %326 {strides = array<i32>} : memref<2x2x16xf32, #tpu.memory_space<vmem>>, vector<1x2x16xf32>,
    %327 = vector.extract_strided_slice %294 {offsets = [0, 0], sizes = [2, 16], strides = [1, 1]} : vector<2x32xf32> to vector<2x16xf32>
    %c0_70 = arith.constant 0 : index
    %c0_71 = arith.constant 0 : index
    %c0_72 = arith.constant 0 : index
    %328 = vector.load %arg8[%c0_70, %c0_71, %c0_72] : memref<2x2x16xf32, #tpu.memory_space<vmem>>, vector<1x2x16xf32>
    %329 = vector.shape_cast %328 : vector<1x2x16xf32> to vector<2x16xf32>
    %330 = vector.shape_cast %327 : vector<2x16xf32> to vector<1x2x16xf32>
    tpu.vector_store %arg8[%c0_70, %c0_71, %c0_72], %330 {strides = array<i32>} : memref<2x2x16xf32, #tpu.memory_space<vmem>>, vector<1x2x16xf32>,
    %331 = vector.extract_strided_slice %294 {offsets = [0, 16], sizes = [2, 16], strides = [1, 1]} : vector<2x32xf32> to vector<2x16xf32>
    %c1_73 = arith.constant 1 : index
    %c0_74 = arith.constant 0 : index
    %c0_75 = arith.constant 0 : index
    %332 = vector.load %arg8[%c1_73, %c0_74, %c0_75] : memref<2x2x16xf32, #tpu.memory_space<vmem>>, vector<1x2x16xf32>
    %333 = vector.shape_cast %332 : vector<1x2x16xf32> to vector<2x16xf32>
    %334 = vector.shape_cast %331 : vector<2x16xf32> to vector<1x2x16xf32>
    tpu.vector_store %arg8[%c1_73, %c0_74, %c0_75], %334 {strides = array<i32>} : memref<2x2x16xf32, #tpu.memory_space<vmem>>, vector<1x2x16xf32>,
    return
  }
}

</mosaic_0001>

<bundles_post_ra>
// kernel: tpu_custom_call.1
= control target key start
LH: loop header
LB: loop body
LE: loop exit
PB: predicated region body
PF: predicated region fallthrough
CT: control target
= control target key end

     0   :  { %14 = vsyncpa [#allocation3], 0  ;;  %s1503_s0 = inlined_call_operand.hbm [shape: bf16[16,32], index: 0, kind: input, shape index: {}]   ;;  %s1504_s1 = inlined_call_operand.hbm [shape: bf16[32,128], index: 1, kind: input, shape index: {}]   ;;  %s1505_s2 = inlined_call_operand.hbm [shape: bf16[32,128], index: 2, kind: input, shape index: {}]   ;;  %s1506_s3 = inlined_call_operand.vmem [shape: f32[1,128], index: 3, kind: input, shape index: {}]   ;;  %s1507_s4 = inlined_call_operand.vmem [shape: f32[2,32], index: 4, kind: input, shape index: {}]   ;;  %s1508_s5 = inlined_call_operand.vmem [shape: f32[2,32], index: 5, kind: input, shape index: {}]   ;;  %s1509_s6 = inlined_call_operand.hbm [shape: f32[8,2,32], index: 6, kind: output, shape index: {0}]   ;;  %s1510_s7 = inlined_call_operand.hbm [shape: f32[2,2,16], index: 7, kind: output, shape index: {1}]   ;;  %s1511_s8 = inlined_call_operand.hbm [shape: f32[2,2,16], index: 8, kind: output, shape index: {2}]  }
   0x1   :  { %15 = vsyncpa [#allocation6], 0 }
   0x2   :  { %16 = vsyncpa [#allocation4], 0 }
   0x3   :  { %17 = vsyncpa [#allocation10], 0  ;;  %s1226_s27 = smov [#allocation5]   ;;  %s1227_s29 = smov [#allocation2]  }
   0x4   :  { %s35_s28 = sshll.u32 %s1226_s27, 4  ;;  %s23_s30 = sshll.u32 %s1227_s29, 4  ;;  %s36_s28 = int_to_ptr.vmem [resolvable:$true] %s35_s28  ;;  %s24_s30 = int_to_ptr.vmem [resolvable:$true] %s23_s30 }
   0x5   :  { %s1106_s9 = scalar_lea.vmem %s36_s28, 256  ;;  %p1111_p1 = scmp.lt.s32.totalorder %s36_s28, %s36_s28 }
   0x6   :  { %p1107_p0 = scmp.ne.s32.totalorder %s36_s28, %s1106_s9  ;;  %p1112_p2 = scmp.lt.s32.totalorder %s1106_s9, %s1106_s9 }
   0x8   :  { %p1113_p3 = por %p1112_p2, %p1111_p1 }
   0xa   :  { %p1114_p4 = pnand %p1113_p3, %p1107_p0 }
   0xc   :  { %1117 = shalt.err (!%p1114_p4)
}
   0xd   :  { %s1228_s10 = smov 64   ;;  %s1229_s11 = smov 4  }
   0xe   :  { %41 = dma.hbm_to_vmem [thread:$0]  %s1504_s1, 256, %s36_s28, [#allocation6], %s1228_s10, %s1228_s10, %s1229_s11  }
   0xf   :  { %s1126_s14 = scalar_lea.vmem %s24_s30, 128  ;;  %p1131_p6 = scmp.lt.s32.totalorder %s24_s30, %s24_s30 }
  0x10   :  { %p1127_p5 = scmp.ne.s32.totalorder %s24_s30, %s1126_s14  ;;  %p1132_p7 = scmp.lt.s32.totalorder %s1126_s14, %s1126_s14 }
  0x12   :  { %p1133_p8 = por %p1132_p7, %p1131_p6 }
  0x14   :  { %p1134_p9 = pnand %p1133_p8, %p1127_p5 }
  0x16   :  { %1137 = shalt.err (!%p1134_p9)
}
  0x17   :  { %29 = dma.hbm_to_vmem [thread:$0]  %s1503_s0, 128, %s24_s30, [#allocation3], %s1228_s10, %s1228_s10, %s1229_s11  }
  0x18   :  { %s1230_s17 = smov [#allocation7]  }
  0x19   :  { %s47_s18 = sshll.u32 %s1230_s17, 4  ;;  %s48_s18 = int_to_ptr.vmem [resolvable:$true] %s47_s18 }
  0x1a   :  { %s1146_s19 = scalar_lea.vmem %s48_s18, 256  ;;  %p1151_p11 = scmp.lt.s32.totalorder %s48_s18, %s48_s18 }
  0x1b   :  { %p1147_p10 = scmp.ne.s32.totalorder %s48_s18, %s1146_s19  ;;  %p1152_p12 = scmp.lt.s32.totalorder %s1146_s19, %s1146_s19 }
  0x1d   :  { %p1153_p13 = por %p1152_p12, %p1151_p11 }
  0x1f   :  { %p1154_p0 = pnand %p1153_p13, %p1147_p10 }
  0x21   :  { %1157 = shalt.err (!%p1154_p0)
}
  0x22   :  { %53 = dma.hbm_to_vmem [thread:$0]  %s1505_s2, 256, %s48_s18, [#allocation6], %s1228_s10, %s1228_s10, %s1229_s11  }
  0x23   :  { %1218 = dma.done.wait [#allocation3], 128  }
  0x24   :  { %1219 = vsyncadd [#allocation3], 4294967168 }
  0x25   :  { %1220 = dma.done.wait [#allocation6], 512  }
  0x26   :  { %1221 = vsyncadd [#allocation6], 4294966784  ;;  %v1231_v0 = vmov 0.0   ;;  %vm1232_vm0 = vmmov 0   ;;  %v1029_v1 = vld [vmem:[#allocation5 + $0x8] sm:$0xff]   ;;  %v1307_v2 = vld [vmem:[#allocation7 + $0x8] sm:$0xff]   ;;  %v145_v8 = vlaneseq }
  0x27   :  { %942 = vmatprep.subr.bf16.mxu0 %v1231_v0  ;;  %950 = vmatprep.subr.bf16.mxu1 %v1231_v0  ;;  %v1031_v3 = vld [vmem:[#allocation5] sm:$0xff]   ;;  %v1312_v4 = vld [vmem:[#allocation7] sm:$0xff]   ;;  %v1032_v5 = vld [vmem:[#allocation2] sm:$0xff]   ;;  %vm100_vm1 = vcmask 261120   ;;  %s1233_s23 = smov 32   ;;  %vm809_vm3 = vcmask 123904  }
  0x28   :  { %946 = vmatprep.mubr.msk.bf16.mxu0 %vm1232_vm0, %v1231_v0  ;;  %954 = vmatprep.mubr.msk.bf16.mxu1 %vm1232_vm0, %v1231_v0  ;;  %v174_v6 = vld [vmem:[%s1507_s4] sm:$0x3]  ;;  %v146_v9 = vand.u32 127, %v145_v8  ;;  %vm818_vm4 = vcmask 255104   ;;  %s1235_s24 = smov 80   ;;  %s1236_s25 = smov 96  }
  0x29   :  { %943 = vmatpush3.bf16.msra.mxu0 %v1029_v1  ;;  %951 = vmatpush3.bf16.msra.mxu1 %v1307_v2  ;;  %v176_v7 = vpack.c.bf16 %v174_v6, %v174_v6  ;;  %v892_v10 = vld [vmem:[%s1506_s3] ss:$0 sm:$0xff]  ;;  %s1237_s26 = smov [#allocation9]   ;;  %s1238_s28 = smov [#allocation8]  }
  0x2a   :  { %944 = vmatprep.subr.bf16.mxu0 %v1231_v0  ;;  %952 = vmatprep.subr.bf16.mxu1 %v1231_v0  ;;  %v151_v12 = vand.u32 31, %v146_v9  ;;  %v175_v32 = vld [vmem:[%s1508_s5] sm:$0x3]  ;;  %s1234_s5 = smov 16   ;;  %s860_s27 = sshll.u32 %s1237_s26, 4  ;;  %s861_s27 = int_to_ptr.vmem [resolvable:$true] %s860_s27 }
  0x2b   :  { %s848_s29 = sshll.u32 %s1238_s28, 4  ;;  %s1239_s30 = smov [#allocation11]   ;;  %s849_s29 = int_to_ptr.vmem [resolvable:$true] %s848_s29 }
  0x2c   :  { %vm159_vm2 = vcmp.lt.s32.totalorder %v151_v12, 16  ;;  %s872_s9 = sshll.u32 %s1239_s30, 4  ;;  %p1163_p2 = scmp.lt.s32.totalorder %s861_s27, %s861_s27  ;;  %s1478_s9 = int_to_ptr.vmem [resolvable:$true] %s872_s9 }
  0x2d   :  { %945 = vmatpush3.bf16.msra.mxu0 %v1031_v3  ;;  %953 = vmatpush3.bf16.msra.mxu1 %v1312_v4 }
  0x2e   :  { %958 = vmatprep.subr.bf16.mxu0 %v1231_v0  ;;  %966 = vmatprep.subr.bf16.mxu1 %v1231_v0 }
  0x30   :  { %947 = vmatmul.mubr.msk.bf16.vlgmr.msra.gmra.mxu0 %vm100_vm1, %v1032_v5  ;;  %955 = vmatmul.mubr.msk.bf16.vlgmr.msra.gmra.mxu1 %vm100_vm1, %v176_v7 }
  0x31   :  { %959 = vmatpush3.bf16.msra.mxu0 %v1307_v2  ;;  %962 = vmatprep.mubr.msk.bf16.mxu0 %vm1232_vm0, %v1231_v0 }
  0x32   :  { %960 = vmatprep.subr.bf16.mxu0 %v1231_v0  ;;  %967 = vmatpush3.bf16.msra.mxu1 %v1307_v2 }
  0x33   :  { %970 = vmatprep.mubr.msk.bf16.mxu1 %vm1232_vm0, %v1231_v0  ;;  %968 = vmatprep.subr.bf16.mxu1 %v1231_v0 }
  0x35   :  { %961 = vmatpush3.bf16.msra.mxu0 %v1312_v4 }
  0x36   :  { %974 = vmatprep.subr.bf16.mxu0 %v1231_v0  ;;  %969 = vmatpush3.bf16.msra.mxu1 %v1312_v4 }
  0x37   :  { %982 = vmatprep.subr.bf16.mxu1 %v1231_v0 }
  0xf0   :  { %v138_v11 = vpop.f32.mrf.mxu0  ;;  %v230_v14 = vpop.f32.mrf.mxu1 }
  0xf1   :  { %v139_v13 = vadd.f32 %v892_v10, %v138_v11 }
  0xf2   :  { %v948_v15 = vpop.f32.mrf.mxu0  ;;  %v956_v16 = vpop.f32.mrf.mxu1 }
  0xf3   :  { %v168_v20 = vrot.slane %v139_v13, 6  ;;  %v171_v21 = vrot.slane %v139_v13, 2 }
  0xf4   :  { %v141_v17 = vpop.f32.mrf.mxu0  ;;  %v233_v19 = vpop.f32.mrf.mxu1 }
  0xf5   :  { %v142_v18 = vadd.f32 %v892_v10, %v141_v17 }
  0xf6   :  { %v949_v22 = vpop.f32.mrf.mxu0  ;;  %v957_v24 = vpop.f32.mrf.mxu1 }
  0xf7   :  { %v161_v23 = vrot.slane %v142_v18, 6  ;;  %v164_v25 = vrot.slane %v142_v18, 2  ;;  %v1337_v26 = vsel %vm159_vm2, %v142_v18, %v168_v20  ;;  %v1339_v27 = vsel %vm159_vm2, %v142_v18, %v171_v21 }
  0xf9   :  { %v1341_v28 = vsel %vm159_vm2, %v139_v13, %v161_v23  ;;  %v1343_v29 = vsel %vm159_vm2, %v139_v13, %v164_v25 }
  0xfa   :  { %v231_v30 = vadd.f32 %v230_v14, %v1341_v28  ;;  %v269_v48 = vrot.slane %v1343_v29, 2  ;;  %v343_v8 = vrot.slane %v1341_v28, 4 }
  0xfc   :  { %1034 = vtanh.f32 %v231_v30  ;;  %v900_v33 = vmul.f32 -1.442695, %v231_v30 }
  0xfe   :  { %1036 = vpow2.f32 %v900_v33 }
 0x109   :  { %v1035_v31 = vpop.eup %1034 }
 0x10a   :  { %249 = vrot.lane.b32.xlu0 %v1035_v31, %s1228_s10 }
 0x10b   :  { %v1037_v34 = vpop.eup %1036 }
 0x10c   :  { %v239_v35 = vadd.f32 1.0, %v1037_v34 }
 0x10e   :  { %244 = vrot.lane.b32.xlu0 %v175_v32, %s1233_s23  ;;  %1038 = vrcp.f32 %v239_v35  ;;  %v416_v32 = vrot.slane %v1343_v29, 6 }
 0x11b   :  { %v1039_v36 = vpop.eup %1038 }
 0x17c   :  { %v250_v37 = vpop.permute.xlu0 %249 }
 0x17d   :  { %v252_v38 = vmul.f32 %v1039_v36, %v250_v37 }
 0x17f   :  { %254 = vrot.lane.b32.xlu1 %v252_v38, %s1233_s23 }
 0x180   :  { %v245_v39 = vpop.permute.xlu0 %244 }
 0x181   :  { %v247_v40 = vmul.f32 %v1039_v36, %v245_v39 }
 0x1f1   :  { %v255_v41 = vpop.permute.xlu1 %254 }
 0x1f2   :  { %v257_v42 = vadd.f32 %v255_v41, %v247_v40 }
 0x1f4   :  { %1040 = vtanh.f32 %v257_v42 }
 0x201   :  { %v1041_v43 = vpop.eup %1040 }
 0x202   :  { %260 = vrot.lane.b32.xlu1 %v1041_v43, %s1228_s10 }
 0x274   :  { %v261_v44 = vpop.permute.xlu1 %260 }
 0x275   :  { %v1353_v45 = vmul.f32 %v1039_v36, %v261_v44 }
 0x277   :  { %v264_v46 = vpack.c.bf16 %v1353_v45, %v1353_v45 }
 0x279   :  { %266 = vrot.lane.b32.xlu0 %v264_v46, %s1233_s23 }
 0x2eb   :  { %v267_v47 = vpop.permute.xlu0 %266 }
 0x2ec   :  { %963 = vmatmul.mubr.msk.bf16.vlgmr.msra.gmra.mxu0 %vm100_vm1, %v267_v47 }
 0x2ed   :  { %975 = vmatpush3.bf16.msra.mxu0 %v1307_v2  ;;  %978 = vmatprep.mubr.msk.bf16.mxu0 %vm1232_vm0, %v1231_v0 }
 0x2ee   :  { %976 = vmatprep.subr.bf16.mxu0 %v1231_v0 }
 0x2f1   :  { %977 = vmatpush3.bf16.msra.mxu0 %v1312_v4 }
 0x2f2   :  { %990 = vmatprep.subr.bf16.mxu0 %v1231_v0 }
 0x3ac   :  { %v308_v49 = vpop.f32.mrf.mxu0 }
 0x3ad   :  { %v309_v50 = vadd.f32 %v308_v49, %v269_v48 }
 0x3ae   :  { %v964_v51 = vpop.f32.mrf.mxu0 }
 0x3af   :  { %1042 = vtanh.f32 %v309_v50  ;;  %v902_v55 = vmul.f32 -1.442695, %v309_v50 }
 0x3b0   :  { %v311_v52 = vpop.f32.mrf.mxu0 }
 0x3b1   :  { %1044 = vpow2.f32 %v902_v55 }
 0x3b2   :  { %v965_v53 = vpop.f32.mrf.mxu0 }
 0x3bc   :  { %v1043_v54 = vpop.eup %1042 }
 0x3bd   :  { %323 = vrot.lane.b32.xlu1 %v1043_v54, %s1228_s10 }
 0x3be   :  { %v1045_v56 = vpop.eup %1044 }
 0x3bf   :  { %v317_v57 = vadd.f32 1.0, %v1045_v56 }
 0x3c1   :  { %1046 = vrcp.f32 %v317_v57 }
 0x3ce   :  { %v1047_v58 = vpop.eup %1046 }
 0x3cf   :  { %v321_v61 = vmul.f32 %v1047_v58, %v257_v42 }
 0x42f   :  { %v324_v59 = vpop.permute.xlu1 %323 }
 0x430   :  { %v326_v60 = vmul.f32 %v1047_v58, %v324_v59 }
 0x432   :  { %328 = vrot.lane.b32.xlu0 %v326_v60, %s1233_s23 }
 0x4a4   :  { %v329_v62 = vpop.permute.xlu0 %328 }
 0x4a5   :  { %v331_v63 = vadd.f32 %v329_v62, %v321_v61 }
 0x4a7   :  { %1048 = vtanh.f32 %v331_v63 }
 0x4b4   :  { %v1049_v1 = vpop.eup %1048 }
 0x4b5   :  { %334 = vrot.lane.b32.xlu1 %v1049_v1, %s1228_s10 }
 0x527   :  { %v335_v3 = vpop.permute.xlu1 %334 }
 0x528   :  { %v1369_v5 = vmul.f32 %v1047_v58, %v335_v3 }
 0x52a   :  { %v338_v6 = vpack.c.bf16 %v1369_v5, %v1369_v5 }
 0x52c   :  { %340 = vrot.lane.b32.xlu0 %v338_v6, %s1233_s23 }
 0x59e   :  { %v341_v7 = vpop.permute.xlu0 %340 }
 0x59f   :  { %971 = vmatmul.mubr.msk.bf16.vlgmr.msra.gmra.mxu1 %vm100_vm1, %v341_v7 }
 0x5a0   :  { %983 = vmatpush3.bf16.msra.mxu1 %v1307_v2  ;;  %986 = vmatprep.mubr.msk.bf16.mxu1 %vm1232_vm0, %v1231_v0 }
 0x5a1   :  { %984 = vmatprep.subr.bf16.mxu1 %v1231_v0 }
 0x5a4   :  { %985 = vmatpush3.bf16.msra.mxu1 %v1312_v4 }
 0x5a5   :  { %998 = vmatprep.subr.bf16.mxu1 %v1231_v0 }
 0x65f   :  { %v382_v9 = vpop.f32.mrf.mxu1 }
 0x660   :  { %v383_v10 = vadd.f32 %v382_v9, %v343_v8 }
 0x661   :  { %v972_v11 = vpop.f32.mrf.mxu1 }
 0x662   :  { %1050 = vtanh.f32 %v383_v10  ;;  %v904_v15 = vmul.f32 -1.442695, %v383_v10 }
 0x663   :  { %v385_v12 = vpop.f32.mrf.mxu1 }
 0x664   :  { %1052 = vpow2.f32 %v904_v15 }
 0x665   :  { %v973_v13 = vpop.f32.mrf.mxu1 }
 0x666   :  { %v561_v13 = vrot.slane %v1339_v27, 2 }
 0x66f   :  { %v1051_v14 = vpop.eup %1050 }
 0x670   :  { %397 = vrot.lane.b32.xlu1 %v1051_v14, %s1228_s10 }
 0x671   :  { %v1053_v16 = vpop.eup %1052 }
 0x672   :  { %v391_v17 = vadd.f32 1.0, %v1053_v16 }
 0x674   :  { %1054 = vrcp.f32 %v391_v17 }
 0x681   :  { %v1055_v18 = vpop.eup %1054 }
 0x682   :  { %v395_v21 = vmul.f32 %v1055_v18, %v331_v63 }
 0x6e2   :  { %v398_v19 = vpop.permute.xlu1 %397 }
 0x6e3   :  { %v400_v20 = vmul.f32 %v1055_v18, %v398_v19 }
 0x6e5   :  { %402 = vrot.lane.b32.xlu0 %v400_v20, %s1233_s23 }
 0x757   :  { %v403_v22 = vpop.permute.xlu0 %402 }
 0x758   :  { %v405_v23 = vadd.f32 %v403_v22, %v395_v21 }
 0x75a   :  { %1056 = vtanh.f32 %v405_v23 }
 0x767   :  { %v1057_v24 = vpop.eup %1056 }
 0x768   :  { %408 = vrot.lane.b32.xlu1 %v1057_v24, %s1228_s10 }
 0x7da   :  { %v409_v25 = vpop.permute.xlu1 %408 }
 0x7db   :  { %v1385_v28 = vmul.f32 %v1055_v18, %v409_v25 }
 0x7dd   :  { %v412_v30 = vpack.c.bf16 %v1385_v28, %v1385_v28 }
 0x7df   :  { %414 = vrot.lane.b32.xlu0 %v412_v30, %s1233_s23 }
 0x851   :  { %v415_v31 = vpop.permute.xlu0 %414 }
 0x852   :  { %979 = vmatmul.mubr.msk.bf16.vlgmr.msra.gmra.mxu0 %vm100_vm1, %v415_v31 }
 0x853   :  { %991 = vmatpush3.bf16.msra.mxu0 %v1307_v2  ;;  %994 = vmatprep.mubr.msk.bf16.mxu0 %vm1232_vm0, %v1231_v0 }
 0x854   :  { %992 = vmatprep.subr.bf16.mxu0 %v1231_v0 }
 0x857   :  { %993 = vmatpush3.bf16.msra.mxu0 %v1312_v4 }
 0x858   :  { %1006 = vmatprep.subr.bf16.mxu0 %v1231_v0 }
 0x912   :  { %v455_v33 = vpop.f32.mrf.mxu0 }
 0x913   :  { %v456_v34 = vadd.f32 %v455_v33, %v416_v32 }
 0x914   :  { %v980_v35 = vpop.f32.mrf.mxu0 }
 0x915   :  { %1058 = vtanh.f32 %v456_v34  ;;  %v906_v39 = vmul.f32 -1.442695, %v456_v34  ;;  %v635_v35 = vrot.slane %v1337_v26, 4 }
 0x916   :  { %v458_v36 = vpop.f32.mrf.mxu0 }
 0x917   :  { %1060 = vpow2.f32 %v906_v39 }
 0x918   :  { %v981_v37 = vpop.f32.mrf.mxu0 }
 0x922   :  { %v1059_v38 = vpop.eup %1058 }
 0x923   :  { %470 = vrot.lane.b32.xlu1 %v1059_v38, %s1228_s10 }
 0x924   :  { %v1061_v40 = vpop.eup %1060 }
 0x925   :  { %v464_v41 = vadd.f32 1.0, %v1061_v40 }
 0x927   :  { %1062 = vrcp.f32 %v464_v41 }
 0x934   :  { %v1063_v42 = vpop.eup %1062 }
 0x935   :  { %v468_v29 = vmul.f32 %v1063_v42, %v405_v23 }
 0x995   :  { %v471_v43 = vpop.permute.xlu1 %470 }
 0x996   :  { %v473_v44 = vmul.f32 %v1063_v42, %v471_v43 }
 0x998   :  { %475 = vrot.lane.b32.xlu0 %v473_v44, %s1233_s23 }
 0xa0a   :  { %v476_v46 = vpop.permute.xlu0 %475 }
 0xa0b   :  { %v478_v47 = vadd.f32 %v476_v46, %v468_v29 }
 0xa0d   :  { %1064 = vtanh.f32 %v478_v47 }
 0xa1a   :  { %v1065_v48 = vpop.eup %1064 }
 0xa1b   :  { %481 = vrot.lane.b32.xlu1 %v1065_v48, %s1228_s10 }
 0xa8d   :  { %v482_v49 = vpop.permute.xlu1 %481 }
 0xa8e   :  { %v1401_v50 = vmul.f32 %v1063_v42, %v482_v49 }
 0xa90   :  { %v485_v51 = vpack.c.bf16 %v1401_v50, %v1401_v50 }
 0xa92   :  { %487 = vrot.lane.b32.xlu0 %v485_v51, %s1233_s23 }
 0xb04   :  { %v488_v52 = vpop.permute.xlu0 %487 }
 0xb05   :  { %987 = vmatmul.mubr.msk.bf16.vlgmr.msra.gmra.mxu1 %vm100_vm1, %v488_v52 }
 0xb06   :  { %999 = vmatpush3.bf16.msra.mxu1 %v1307_v2  ;;  %1002 = vmatprep.mubr.msk.bf16.mxu1 %vm1232_vm0, %v1231_v0 }
 0xb07   :  { %1000 = vmatprep.subr.bf16.mxu1 %v1231_v0 }
 0xb0a   :  { %1001 = vmatpush3.bf16.msra.mxu1 %v1312_v4 }
 0xbc5   :  { %v526_v53 = vpop.f32.mrf.mxu1 }
 0xbc6   :  { %v527_v54 = vadd.f32 %v526_v53, %v1337_v26 }
 0xbc7   :  { %v988_v55 = vpop.f32.mrf.mxu1 }
 0xbc8   :  { %1066 = vtanh.f32 %v527_v54  ;;  %v908_v59 = vmul.f32 -1.442695, %v527_v54 }
 0xbc9   :  { %v529_v56 = vpop.f32.mrf.mxu1 }
 0xbca   :  { %1068 = vpow2.f32 %v908_v59  ;;  %v708_v56 = vrot.slane %v1339_v27, 6 }
 0xbcb   :  { %v989_v57 = vpop.f32.mrf.mxu1 }
 0xbd5   :  { %v1067_v58 = vpop.eup %1066 }
 0xbd6   :  { %541 = vrot.lane.b32.xlu1 %v1067_v58, %s1228_s10 }
 0xbd7   :  { %v1069_v60 = vpop.eup %1068 }
 0xbd8   :  { %v535_v61 = vadd.f32 1.0, %v1069_v60 }
 0xbda   :  { %1070 = vrcp.f32 %v535_v61 }
 0xbe7   :  { %v1071_v62 = vpop.eup %1070 }
 0xbe8   :  { %v539_v3 = vmul.f32 %v1071_v62, %v478_v47 }
 0xc48   :  { %v542_v63 = vpop.permute.xlu1 %541 }
 0xc49   :  { %v544_v1 = vmul.f32 %v1071_v62, %v542_v63 }
 0xc4b   :  { %546 = vrot.lane.b32.xlu0 %v544_v1, %s1233_s23 }
 0xcbd   :  { %v547_v6 = vpop.permute.xlu0 %546 }
 0xcbe   :  { %v549_v7 = vadd.f32 %v547_v6, %v539_v3 }
 0xcc0   :  { %1072 = vtanh.f32 %v549_v7 }
 0xccd   :  { %v1073_v8 = vpop.eup %1072 }
 0xcce   :  { %552 = vrot.lane.b32.xlu1 %v1073_v8, %s1228_s10 }
 0xd40   :  { %v553_v9 = vpop.permute.xlu1 %552 }
 0xd41   :  { %v1416_v10 = vmul.f32 %v1071_v62, %v553_v9 }
 0xd43   :  { %v556_v11 = vpack.c.bf16 %v1416_v10, %v1416_v10 }
 0xd45   :  { %558 = vrot.lane.b32.xlu0 %v556_v11, %s1233_s23 }
 0xdb7   :  { %v559_v12 = vpop.permute.xlu0 %558 }
 0xdb8   :  { %995 = vmatmul.mubr.msk.bf16.vlgmr.msra.gmra.mxu0 %vm100_vm1, %v559_v12 }
 0xdb9   :  { %1007 = vmatpush3.bf16.msra.mxu0 %v1307_v2  ;;  %1010 = vmatprep.mubr.msk.bf16.mxu0 %vm1232_vm0, %v1231_v0 }
 0xdba   :  { %1008 = vmatprep.subr.bf16.mxu0 %v1231_v0 }
 0xdbd   :  { %1009 = vmatpush3.bf16.msra.mxu0 %v1312_v4 }
 0xe78   :  { %v600_v14 = vpop.f32.mrf.mxu0 }
 0xe79   :  { %v601_v15 = vadd.f32 %v600_v14, %v561_v13 }
 0xe7a   :  { %v996_v16 = vpop.f32.mrf.mxu0 }
 0xe7b   :  { %1074 = vtanh.f32 %v601_v15  ;;  %v910_v20 = vmul.f32 -1.442695, %v601_v15 }
 0xe7c   :  { %v603_v17 = vpop.f32.mrf.mxu0 }
 0xe7d   :  { %1076 = vpow2.f32 %v910_v20 }
 0xe7e   :  { %v997_v18 = vpop.f32.mrf.mxu0 }
 0xe88   :  { %v1075_v19 = vpop.eup %1074 }
 0xe89   :  { %615 = vrot.lane.b32.xlu1 %v1075_v19, %s1228_s10 }
 0xe8a   :  { %v1077_v2 = vpop.eup %1076 }
 0xe8b   :  { %v609_v21 = vadd.f32 1.0, %v1077_v2 }
 0xe8d   :  { %1078 = vrcp.f32 %v609_v21 }
 0xe9a   :  { %v1079_v22 = vpop.eup %1078 }
 0xe9b   :  { %v613_v4 = vmul.f32 %v1079_v22, %v549_v7 }
 0xefb   :  { %v616_v0 = vpop.permute.xlu1 %615 }
 0xefc   :  { %v618_v23 = vmul.f32 %v1079_v22, %v616_v0 }
 0xefe   :  { %620 = vrot.lane.b32.xlu0 %v618_v23, %s1233_s23 }
 0xf70   :  { %v621_v24 = vpop.permute.xlu0 %620 }
 0xf71   :  { %v623_v25 = vadd.f32 %v621_v24, %v613_v4 }
 0xf73   :  { %1080 = vtanh.f32 %v623_v25 }
 0xf80   :  { %v1081_v30 = vpop.eup %1080 }
 0xf81   :  { %626 = vrot.lane.b32.xlu1 %v1081_v30, %s1228_s10 }
 0xff3   :  { %v627_v31 = vpop.permute.xlu1 %626 }
 0xff4   :  { %v1431_v32 = vmul.f32 %v1079_v22, %v627_v31 }
 0xff6   :  { %v630_v33 = vpack.c.bf16 %v1431_v32, %v1431_v32 }
 0xff8   :  { %632 = vrot.lane.b32.xlu0 %v630_v33, %s1233_s23 }
0x106a   :  { %v633_v34 = vpop.permute.xlu0 %632 }
0x106b   :  { %1003 = vmatmul.mubr.msk.bf16.vlgmr.msra.gmra.mxu1 %vm100_vm1, %v633_v34 }
0x112b   :  { %v674_v36 = vpop.f32.mrf.mxu1 }
0x112c   :  { %v675_v37 = vadd.f32 %v674_v36, %v635_v35 }
0x112d   :  { %v1004_v38 = vpop.f32.mrf.mxu1 }
0x112e   :  { %1082 = vtanh.f32 %v675_v37  ;;  %v912_v42 = vmul.f32 -1.442695, %v675_v37 }
0x112f   :  { %v677_v39 = vpop.f32.mrf.mxu1 }
0x1130   :  { %1084 = vpow2.f32 %v912_v42 }
0x1131   :  { %v1005_v40 = vpop.f32.mrf.mxu1 }
0x113b   :  { %v1083_v41 = vpop.eup %1082 }
0x113c   :  { %689 = vrot.lane.b32.xlu1 %v1083_v41, %s1228_s10 }
0x113d   :  { %v1085_v43 = vpop.eup %1084 }
0x113e   :  { %v683_v44 = vadd.f32 1.0, %v1085_v43 }
0x1140   :  { %1086 = vrcp.f32 %v683_v44 }
0x114d   :  { %v1087_v29 = vpop.eup %1086 }
0x114e   :  { %v687_v26 = vmul.f32 %v1087_v29, %v623_v25 }
0x11ae   :  { %v690_v46 = vpop.permute.xlu1 %689 }
0x11af   :  { %v692_v47 = vmul.f32 %v1087_v29, %v690_v46 }
0x11b1   :  { %694 = vrot.lane.b32.xlu0 %v692_v47, %s1233_s23 }
0x1223   :  { %v695_v48 = vpop.permute.xlu0 %694 }
0x1224   :  { %v697_v49 = vadd.f32 %v695_v48, %v687_v26 }
0x1226   :  { %1088 = vtanh.f32 %v697_v49 }
0x1233   :  { %v1089_v51 = vpop.eup %1088 }
0x1234   :  { %700 = vrot.lane.b32.xlu1 %v1089_v51, %s1228_s10 }
0x12a6   :  { %v701_v52 = vpop.permute.xlu1 %700 }
0x12a7   :  { %v703_v53 = vmul.f32 %v1087_v29, %v701_v52 }
0x12a9   :  { %v704_v54 = vpack.c.bf16 %v703_v53, %v703_v53 }
0x12ab   :  { %706 = vrot.lane.b32.xlu0 %v704_v54, %s1233_s23 }
0x131d   :  { %v707_v55 = vpop.permute.xlu0 %706 }
0x131e   :  { %1011 = vmatmul.mubr.msk.bf16.vlgmr.msra.gmra.mxu0 %vm100_vm1, %v707_v55 }
0x13de   :  { %v747_v57 = vpop.f32.mrf.mxu0 }
0x13df   :  { %v748_v58 = vadd.f32 %v747_v57, %v708_v56 }
0x13e0   :  { %v1012_v59 = vpop.f32.mrf.mxu0 }
0x13e1   :  { %1090 = vtanh.f32 %v748_v58  ;;  %v914_v63 = vmul.f32 -1.442695, %v748_v58 }
0x13e2   :  { %v750_v60 = vpop.f32.mrf.mxu0 }
0x13e3   :  { %1092 = vpow2.f32 %v914_v63 }
0x13e4   :  { %v1013_v61 = vpop.f32.mrf.mxu0 }
0x13ee   :  { %v1091_v62 = vpop.eup %1090 }
0x13ef   :  { %762 = vrot.lane.b32.xlu1 %v1091_v62, %s1228_s10 }
0x13f0   :  { %v1093_v1 = vpop.eup %1092 }
0x13f1   :  { %v756_v3 = vadd.f32 1.0, %v1093_v1 }
0x13f3   :  { %1094 = vrcp.f32 %v756_v3 }
0x1400   :  { %v1095_v6 = vpop.eup %1094 }
0x1401   :  { %v760_v27 = vmul.f32 %v1095_v6, %v697_v49 }
0x1461   :  { %v763_v7 = vpop.permute.xlu1 %762 }
0x1462   :  { %v765_v8 = vmul.f32 %v1095_v6, %v763_v7 }
0x1464   :  { %767 = vrot.lane.b32.xlu0 %v765_v8, %s1233_s23 }
0x1468   :  { %785 = vrot.lane.b32.xlu0 %v1353_v45, %s1233_s23 }
0x146c   :  { %789 = vrot.lane.b32.xlu0 %v1385_v28, %s1233_s23 }
0x1470   :  { %793 = vrot.lane.b32.xlu0 %v1416_v10, %s1233_s23 }
0x1474   :  { %797 = vrot.lane.b32.xlu0 %v703_v53, %s1233_s23 }
0x14d6   :  { %v768_v9 = vpop.permute.xlu0 %767 }
0x14d7   :  { %v770_v11 = vadd.f32 %v768_v9, %v760_v27 }
0x14d9   :  { %1096 = vtanh.f32 %v770_v11 }
0x14da   :  { %v786_v12 = vpop.permute.xlu0 %785 }
0x14db   :  { %810 = vst.msk [vmem:[#allocation8] sm:$0x3] %vm809_vm3, %v786_v12 }
0x14de   :  { %v790_v13 = vpop.permute.xlu0 %789 }
0x14df   :  { %812 = vst.msk [vmem:[#allocation8 + $0x4] sm:$0x3] %vm809_vm3, %v790_v13 }
0x14e2   :  { %v794_v45 = vpop.permute.xlu0 %793 }
0x14e3   :  { %814 = vst.msk [vmem:[#allocation8 + $0x8] sm:$0x3] %vm809_vm3, %v794_v45 }
0x14e6   :  { %v1097_v28 = vpop.eup %1096  ;;  %v798_v14 = vpop.permute.xlu0 %797 }
0x14e7   :  { %816 = vst.msk [vmem:[#allocation8 + $0xc] sm:$0x3] %vm809_vm3, %v798_v14  ;;  %773 = vrot.lane.b32.xlu1 %v1097_v28, %s1228_s10  ;;  %s1158_s10 = scalar_lea.vmem %s861_s27, 64 }
0x14e8   :  { %p1159_p1 = scmp.ne.s32.totalorder %s861_s27, %s1158_s10  ;;  %p1164_p3 = scmp.lt.s32.totalorder %s1158_s10, %s1158_s10 }
0x14ea   :  { %p1165_p4 = por %p1164_p3, %p1163_p2 }
0x14eb   :  { %787 = vrot.lane.b32.xlu1 %v1369_v5, %s1233_s23 }
0x14ec   :  { %p1166_p5 = pnand %p1165_p4, %p1159_p1 }
0x14ef   :  { %791 = vrot.lane.b32.xlu1 %v1401_v50, %s1233_s23 }
0x14f3   :  { %795 = vrot.lane.b32.xlu1 %v1431_v32, %s1233_s23 }
0x1559   :  { %v774_v10 = vpop.permute.xlu1 %773 }
0x155a   :  { %v776_v15 = vmul.f32 %v1095_v6, %v774_v10 }
0x155c   :  { %828 = vrot.lane.b32.xlu0 %v776_v15, %s1234_s5  ;;  %799 = vrot.lane.b32.xlu1 %v776_v15, %s1233_s23 }
0x155d   :  { %v788_v16 = vpop.permute.xlu1 %787 }
0x155e   :  { %811 = vst.msk [vmem:[#allocation8 + $0x2] sm:$0x3] %vm809_vm3, %v788_v16 }
0x155f   :  { %825 = vst.msk [vmem:[#allocation8 + $0xc] sm:$0x3] %vm818_vm4, %v788_v16  ;;  %820 = vst.msk [vmem:[#allocation8 + $0x2] sm:$0x3] %vm818_vm4, %v798_v14 }
0x1560   :  { %838 = vrot.lane.b32.xlu0 %v770_v11, %s1235_s24  ;;  %834 = vrot.lane.b32.xlu1 %v770_v11, %s1236_s25 }
0x1561   :  { %v792_v5 = vpop.permute.xlu1 %791 }
0x1562   :  { %813 = vst.msk [vmem:[#allocation8 + $0x6] sm:$0x3] %vm809_vm3, %v792_v5 }
0x1563   :  { %823 = vst.msk [vmem:[#allocation8 + $0x8] sm:$0x3] %vm818_vm4, %v792_v5  ;;  %822 = vst.msk [vmem:[#allocation8 + $0x6] sm:$0x3] %vm818_vm4, %v794_v45 }
0x1565   :  { %v796_v50 = vpop.permute.xlu1 %795 }
0x1566   :  { %815 = vst.msk [vmem:[#allocation8 + $0xa] sm:$0x3] %vm809_vm3, %v796_v50 }
0x1567   :  { %821 = vst.msk [vmem:[#allocation8 + $0x4] sm:$0x3] %vm818_vm4, %v796_v50  ;;  %824 = vst.msk [vmem:[#allocation8 + $0xa] sm:$0x3] %vm818_vm4, %v790_v13 }
0x15ce   :  { %v829_v17 = vpop.permute.xlu0 %828  ;;  %v800_v18 = vpop.permute.xlu1 %799 }
0x15cf   :  { %832 = vst.msk [vmem:[#allocation9 + $0x2] sm:$0x3] %vm809_vm3, %v829_v17  ;;  %817 = vst.msk [vmem:[#allocation8 + $0xe] sm:$0x3] %vm809_vm3, %v800_v18 }
0x15d0   :  { %819 = vst.msk [vmem:[#allocation8] sm:$0x3] %vm818_vm4, %v800_v18  ;;  %826 = vst.msk [vmem:[#allocation8 + $0xe] sm:$0x3] %vm818_vm4, %v786_v12 }
0x15d1   :  { %827 = vst.msk [vmem:[#allocation9] sm:$0x3] %vm809_vm3, %v800_v18 }
0x15d2   :  { %1169 = shalt.err (!%p1166_p5)
}
0x15d3   :  { %s1240_s11 = smov 2   ;;  %s1178_s14 = scalar_lea.vmem %s849_s29, 256 }
0x15d4   :  { %866 = dma.vmem_to_hbm [thread:$0]  %s861_s27, 64, %s1510_s7, [#allocation10], %s1233_s23, %s1233_s23, %s1240_s11  }
0x15d5   :  { %p1179_p6 = scmp.ne.s32.totalorder %s849_s29, %s1178_s14  ;;  %p1183_p7 = scmp.lt.s32.totalorder %s849_s29, %s849_s29 }
0x15d6   :  { %p1184_p8 = scmp.lt.s32.totalorder %s1178_s14, %s1178_s14 }
0x15d8   :  { %p1185_p9 = por %p1184_p8, %p1183_p7 }
0x15da   :  { %p1186_p10 = pnand %p1185_p9, %p1179_p6 }
0x15dc   :  { %1189 = shalt.err (!%p1186_p10)
}
0x15dd   :  { %854 = dma.vmem_to_hbm [thread:$0]  %s849_s29, 256, %s1509_s6, [#allocation4], %s1233_s23, %s1233_s23, %s1240_s11   ;;  %v839_v19 = vpop.permute.xlu0 %838  ;;  %v835_v20 = vpop.permute.xlu1 %834 }
0x15de   :  { %842 = vst.msk [vmem:[#allocation11 + $0x2] sm:$0x3] %vm809_vm3, %v839_v19  ;;  %837 = vst.msk [vmem:[#allocation11] sm:$0x3] %vm809_vm3, %v835_v20  ;;  %s1198_s7 = scalar_lea.vmem %s1478_s9, 64  ;;  %p1203_p12 = scmp.lt.s32.totalorder %s1478_s9, %s1478_s9 }
0x15df   :  { %p1199_p11 = scmp.ne.s32.totalorder %s1478_s9, %s1198_s7  ;;  %p1204_p13 = scmp.lt.s32.totalorder %s1198_s7, %s1198_s7 }
0x15e1   :  { %p1205_p0 = por %p1204_p13, %p1203_p12 }
0x15e3   :  { %p1206_p1 = pnand %p1205_p0, %p1199_p11 }
0x15e5   :  { %1209 = shalt.err (!%p1206_p1)
}
0x15e6   :  { %878 = dma.vmem_to_hbm [thread:$0]  %s1478_s9, 64, %s1511_s8, [#allocation10], %s1233_s23, %s1233_s23, %s1240_s11  }
0x15e7   :  { %1222 = dma.done.wait [#allocation4], 256  }
0x15e8   :  { %1223 = vsyncadd [#allocation4], 4294967040 }
0x15e9   :  { %1224 = dma.done.wait [#allocation10], 128  }
0x15ea   :  { %1225 = vsyncadd [#allocation10], 4294967168 }
0x15eb   :  { %888 = vsyncpa [#allocation3], 1 }
0x15ec   :  { %889 = vsyncpa [#allocation6], 1 }
0x15ed   :  { %890 = vsyncpa [#allocation4], 1 }
0x15ee   :  { %891 = vsyncpa [#allocation10], 1 }

</bundles_post_ra>
